<compile_context>
chip_gen: v5e
topology: v5e:2x2
jax: 0.10.0
libtpu: 0.0.40
codegen_flags: <defaults>
</compile_context>

<pallas_src>
import functools

import jax
import jax.numpy as jnp
from jax.experimental import pallas as pl
from jax.experimental.pallas import tpu as pltpu


_LANES = 128      # TPU lane width (last dim)
_SUBLANES = 8     # TPU sublane width (second-to-last dim)


def _round_up(n, m):
    return ((n + m - 1) // m) * m


def _pad2(x, rows, cols):
    r, c = x.shape
    return jnp.pad(x, ((0, rows - r), (0, cols - c)))


# unit ids (ModuleList order of _GraphConvolutionLayer_Collect)
COLLECT_SOBJ_FROM_REL = 0   # Linear(dim_rel -> dim_obj)
COLLECT_OOBJ_FROM_REL = 1   # Linear(dim_rel -> dim_obj)
COLLECT_REL_FROM_SOBJ = 2   # Linear(dim_obj -> dim_rel)
COLLECT_REL_FROM_OOBJ = 3   # Linear(dim_obj -> dim_rel)
COLLECT_OBJ_FROM_ATT = 4    # Linear(dim_att -> dim_obj)
COLLECT_ATT_FROM_OBJ = 5    # Linear(dim_obj -> dim_att)
COLLECT_OBJ_FROM_OBJ = 6    # Linear(dim_obj -> dim_obj)


# ---------------------------------------------------------------------------
# Fused kernel: the entire _GraphConvolutionLayer forward, all data in VMEM.
# ---------------------------------------------------------------------------
def _gcn_fused_kernel(
        s_obj_ref, s_att_ref, s_rel_ref,
        a_oo_ref, a_oa_ref, a_sr_ref, a_or_ref,
        w0, b0, w1, b1, w2, b2, w3, b3, w4, b4, w5, b5, w6, b6,
        out_obj_ref, out_att_ref, out_rel_ref):
    f32 = jnp.float32

    s_obj = s_obj_ref[...]
    s_att = s_att_ref[...]
    s_rel = s_rel_ref[...]
    a_oo = a_oo_ref[...]     # (No, No) obj-obj adjacency
    a_oa = a_oa_ref[...]     # (No, Na) obj-att adjacency
    a_sr = a_sr_ref[...]     # (No, Nr) subject-obj <-> rel adjacency
    a_or = a_or_ref[...]     # (No, Nr) object-obj  <-> rel adjacency

    def fc(src, w_ref, b_ref):
        # nn.Linear + ReLU; W is pre-transposed (d_in_pad, d_out_pad).
        y = jnp.dot(src, w_ref[...], preferred_element_type=f32)
        return jnp.maximum(y + b_ref[...], 0.0)

    def collect(attn, h):
        # (attn @ h) / (attn.sum(1) + 1e-7); divide -> EUP reciprocal-multiply.
        s = jnp.dot(attn, h, preferred_element_type=f32)
        inv = pl.reciprocal(jnp.sum(attn, axis=1, keepdims=True) + 1e-7,
                            approx=True)
        return s * inv

    # ---- attribute update:  att <- obj -------------------------------------
    src_att = collect(a_oa.T, fc(s_obj, w5, b5))
    out_att_ref[...] = (s_att + src_att).astype(out_att_ref.dtype)

    # ---- object update:  obj <- att, obj, rel(sub), rel(obj) ---------------
    src_from_att = collect(a_oa, fc(s_att, w4, b4))
    src_from_obj = collect(a_oo, fc(s_obj, w6, b6))
    src_from_rel_s = collect(a_sr, fc(s_rel, w0, b0))
    src_from_rel_o = collect(a_or, fc(s_rel, w1, b1))
    out_obj_ref[...] = (s_obj + 0.25 * (src_from_att + src_from_obj
                                        + src_from_rel_s + src_from_rel_o)
                        ).astype(out_obj_ref.dtype)

    # ---- relation update:  rel <- obj(sub), obj(obj) -----------------------
    src_rel_s = collect(a_sr.T, fc(s_obj, w2, b2))
    src_rel_o = collect(a_or.T, fc(s_obj, w3, b3))
    out_rel_ref[...] = (s_rel + 0.5 * (src_rel_s + src_rel_o)
                        ).astype(out_rel_ref.dtype)


# ---------------------------------------------------------------------------
# Parameters. init_params keeps torch-Linear layout (W: (d_out, d_in),
# b: (1, d_out)) so the pure-JAX reference mirrors PyTorch exactly;
# prepare_kernel_params converts once to the padded kernel layout.
# ---------------------------------------------------------------------------
def init_params(key, dim_obj, dim_att, dim_rel):
    shapes = {
        COLLECT_SOBJ_FROM_REL: (dim_obj, dim_rel),
        COLLECT_OOBJ_FROM_REL: (dim_obj, dim_rel),
        COLLECT_REL_FROM_SOBJ: (dim_rel, dim_obj),
        COLLECT_REL_FROM_OOBJ: (dim_rel, dim_obj),
        COLLECT_OBJ_FROM_ATT: (dim_obj, dim_att),
        COLLECT_ATT_FROM_OBJ: (dim_att, dim_obj),
        COLLECT_OBJ_FROM_OBJ: (dim_obj, dim_obj),
    }
    params = {}
    for uid in range(7):
        d_out, d_in = shapes[uid]
        key, sub = jax.random.split(key)
        w = 0.01 * jax.random.normal(sub, (d_out, d_in), dtype=jnp.float32)
        b = jnp.zeros((1, d_out), dtype=jnp.float32)
        params[uid] = (w, b)
    return params


def prepare_kernel_params(params, d_pad=_LANES):
    """Pre-transpose W to (d_in, d_out) and zero-pad to (d_pad, d_pad) so the
    kernel never transposes weights and all matmuls / stores are lane-dense."""
    kparams = {}
    for uid, (w, b) in params.items():
        d_out, d_in = w.shape
        wt = jnp.zeros((d_pad, d_pad), jnp.float32).at[:d_in, :d_out].set(w.T)
        bp = jnp.zeros((1, d_pad), jnp.float32).at[:, :d_out].set(b)
        kparams[uid] = (wt, bp)
    return kparams


# ---------------------------------------------------------------------------
# Wrapper: pad to TPU-friendly shapes, run the single fused kernel, slice back.
# ---------------------------------------------------------------------------
def graph_conv_layer_forward(kernel_params, score_obj, score_att, score_rel,
                             map_obj_obj, map_obj_att, map_obj_rel):
    n_obj, d_obj = score_obj.shape
    n_att, d_att = score_att.shape
    n_rel, d_rel = score_rel.shape

    d_pad = _round_up(max(d_obj, d_att, d_rel), _LANES)
    no_p = _round_up(n_obj, _SUBLANES)
    na_p = _round_up(n_att, _SUBLANES)
    nr_p = _round_up(n_rel, _SUBLANES)

    s_obj = _pad2(score_obj.astype(jnp.float32), no_p, d_pad)
    s_att = _pad2(score_att.astype(jnp.float32), na_p, d_pad)
    s_rel = _pad2(score_rel.astype(jnp.float32), nr_p, d_pad)

    a_oo = _pad2(map_obj_obj.astype(jnp.float32), no_p, no_p)
    a_oa = _pad2(map_obj_att.astype(jnp.float32), no_p, na_p)
    # two contiguous (N_obj, N_rel) planes instead of strided 3-D slices
    a_sr = _pad2(map_obj_rel[:, :, 0].astype(jnp.float32), no_p, nr_p)
    a_or = _pad2(map_obj_rel[:, :, 1].astype(jnp.float32), no_p, nr_p)

    flat_params = []
    for uid in range(7):
        flat_params.extend(kernel_params[uid])

    vspec = pl.BlockSpec(memory_space=pltpu.MemorySpace.VMEM)
    n_in = 7 + len(flat_params)

    out_obj, out_att, out_rel = pl.pallas_call(
        _gcn_fused_kernel,
        out_shape=(jax.ShapeDtypeStruct((no_p, d_pad), jnp.float32),
                   jax.ShapeDtypeStruct((na_p, d_pad), jnp.float32),
                   jax.ShapeDtypeStruct((nr_p, d_pad), jnp.float32)),
        in_specs=[vspec] * n_in,
        out_specs=(vspec, vspec, vspec),
    )(s_obj, s_att, s_rel, a_oo, a_oa, a_sr, a_or, *flat_params)

    return (out_obj[:n_obj, :d_obj],
            out_att[:n_att, :d_att],
            out_rel[:n_rel, :d_rel])


# ---------------------------------------------------------------------------
# Pure-JAX reference (mirrors the PyTorch math) for correctness checking
# ---------------------------------------------------------------------------
def _ref_collect(attention, source, w, b):
    fc = jnp.maximum(source @ w.T + b, 0.0)
    return (attention @ fc) / (attention.sum(axis=1, keepdims=True) + 1e-7)


def reference_forward(params, score_obj, score_att, score_rel,
                      map_obj_obj, map_obj_att, map_obj_rel):
    c = lambda a, s, u: _ref_collect(a, s, *params[u])
    src = c(map_obj_att.T, score_obj, COLLECT_ATT_FROM_OBJ)
    att_upd = score_att + src
    s_att = c(map_obj_att, score_att, COLLECT_OBJ_FROM_ATT)
    s_obj = c(map_obj_obj, score_obj, COLLECT_OBJ_FROM_OBJ)
    s_rs = c(map_obj_rel[:, :, 0], score_rel, COLLECT_SOBJ_FROM_REL)
    s_ro = c(map_obj_rel[:, :, 1], score_rel, COLLECT_OOBJ_FROM_REL)
    obj_upd = score_obj + (s_att + s_obj + s_rs + s_ro) / 4.0
    s_os = c(map_obj_rel[:, :, 0].T, score_obj, COLLECT_REL_FROM_SOBJ)
    s_oo = c(map_obj_rel[:, :, 1].T, score_obj, COLLECT_REL_FROM_OOBJ)
    rel_upd = score_rel + (s_os + s_oo) / 2.0
    return obj_upd, att_upd, rel_upd


if __name__ == "__main__":
    # small, deterministic example shapes
    N_OBJ, N_ATT, N_REL = 16, 16, 24
    DIM_OBJ, DIM_ATT, DIM_REL = 32, 16, 24

    key = jax.random.PRNGKey(0)
    k_obj, k_att, k_rel, k_par = jax.random.split(key, 4)

    score_obj = jax.random.normal(k_obj, (N_OBJ, DIM_OBJ), dtype=jnp.float32)
    score_att = jax.random.normal(k_att, (N_ATT, DIM_ATT), dtype=jnp.float32)
    score_rel = jax.random.normal(k_rel, (N_REL, DIM_REL), dtype=jnp.float32)

    # adjacency maps (float, binary) — deterministic synthetic graph
    map_obj_obj = (jnp.ones((N_OBJ, N_OBJ)) - jnp.eye(N_OBJ)).astype(jnp.float32)
    map_obj_att = (jnp.eye(N_OBJ)
                   + jnp.roll(jnp.eye(N_OBJ), 1, axis=1)).astype(jnp.float32)

    rel_ids = jnp.arange(N_REL)
    subj_idx = rel_ids % N_OBJ
    obj_idx = (3 * rel_ids + 1) % N_OBJ
    map_obj_rel = jnp.zeros((N_OBJ, N_REL, 2), dtype=jnp.float32)
    map_obj_rel = map_obj_rel.at[subj_idx, rel_ids, 0].set(1.0)
    map_obj_rel = map_obj_rel.at[obj_idx, rel_ids, 1].set(1.0)

    params = init_params(k_par, DIM_OBJ, DIM_ATT, DIM_REL)       # torch layout
    kernel_params = prepare_kernel_params(params)                 # padded layout

    fwd = jax.jit(functools.partial(graph_conv_layer_forward, kernel_params))
    out_obj, out_att, out_rel = fwd(score_obj, score_att, score_rel,
                                    map_obj_obj, map_obj_att, map_obj_rel)
    jax.block_until_ready((out_obj, out_att, out_rel))

    ref_obj, ref_att, ref_rel = reference_forward(
        params, score_obj, score_att, score_rel,
        map_obj_obj, map_obj_att, map_obj_rel)

    assert jnp.allclose(out_obj, ref_obj, rtol=1e-2, atol=1e-3)
    assert jnp.allclose(out_att, ref_att, rtol=1e-2, atol=1e-3)
    assert jnp.allclose(out_rel, ref_rel, rtol=1e-2, atol=1e-3)

    print("KERNEL_OK")
</pallas_src>

<mosaic_0001>
module attributes {stable_mosaic.version = 11 : i64} {
  func.func @_gcn_fused_kernel(%arg0: memref<16x128xf32, #tpu.memory_space<vmem>>, %arg1: memref<16x128xf32, #tpu.memory_space<vmem>>, %arg2: memref<24x128xf32, #tpu.memory_space<vmem>>, %arg3: memref<16x16xf32, #tpu.memory_space<vmem>>, %arg4: memref<16x16xf32, #tpu.memory_space<vmem>>, %arg5: memref<16x24xf32, #tpu.memory_space<vmem>>, %arg6: memref<16x24xf32, #tpu.memory_space<vmem>>, %arg7: memref<128x128xf32, #tpu.memory_space<vmem>>, %arg8: memref<1x128xf32, #tpu.memory_space<vmem>>, %arg9: memref<128x128xf32, #tpu.memory_space<vmem>>, %arg10: memref<1x128xf32, #tpu.memory_space<vmem>>, %arg11: memref<128x128xf32, #tpu.memory_space<vmem>>, %arg12: memref<1x128xf32, #tpu.memory_space<vmem>>, %arg13: memref<128x128xf32, #tpu.memory_space<vmem>>, %arg14: memref<1x128xf32, #tpu.memory_space<vmem>>, %arg15: memref<128x128xf32, #tpu.memory_space<vmem>>, %arg16: memref<1x128xf32, #tpu.memory_space<vmem>>, %arg17: memref<128x128xf32, #tpu.memory_space<vmem>>, %arg18: memref<1x128xf32, #tpu.memory_space<vmem>>, %arg19: memref<128x128xf32, #tpu.memory_space<vmem>>, %arg20: memref<1x128xf32, #tpu.memory_space<vmem>>, %arg21: memref<16x128xf32, #tpu.memory_space<vmem>>, %arg22: memref<16x128xf32, #tpu.memory_space<vmem>>, %arg23: memref<24x128xf32, #tpu.memory_space<vmem>>) attributes {dimension_semantics = [], scalar_prefetch = 0 : i64, scratch_operands = 0 : i64, tpu.core_type = #tpu.core_type<tc>} {
    %c0 = arith.constant 0 : index
    %c0_0 = arith.constant 0 : index
    %0 = vector.load %arg0[%c0, %c0_0] : memref<16x128xf32, #tpu.memory_space<vmem>>, vector<16x128xf32>
    %c0_1 = arith.constant 0 : index
    %c0_2 = arith.constant 0 : index
    %1 = vector.load %arg1[%c0_1, %c0_2] : memref<16x128xf32, #tpu.memory_space<vmem>>, vector<16x128xf32>
    %c0_3 = arith.constant 0 : index
    %c0_4 = arith.constant 0 : index
    %2 = vector.load %arg2[%c0_3, %c0_4] : memref<24x128xf32, #tpu.memory_space<vmem>>, vector<24x128xf32>
    %c0_5 = arith.constant 0 : index
    %c0_6 = arith.constant 0 : index
    %3 = vector.load %arg3[%c0_5, %c0_6] : memref<16x16xf32, #tpu.memory_space<vmem>>, vector<16x16xf32>
    %c0_7 = arith.constant 0 : index
    %c0_8 = arith.constant 0 : index
    %4 = vector.load %arg4[%c0_7, %c0_8] : memref<16x16xf32, #tpu.memory_space<vmem>>, vector<16x16xf32>
    %c0_9 = arith.constant 0 : index
    %c0_10 = arith.constant 0 : index
    %5 = vector.load %arg5[%c0_9, %c0_10] : memref<16x24xf32, #tpu.memory_space<vmem>>, vector<16x24xf32>
    %c0_11 = arith.constant 0 : index
    %c0_12 = arith.constant 0 : index
    %6 = vector.load %arg6[%c0_11, %c0_12] : memref<16x24xf32, #tpu.memory_space<vmem>>, vector<16x24xf32>
    %7 = tpu.transpose %4, [1, 0] : vector<16x16xf32> -> vector<16x16xf32>
    %c0_13 = arith.constant 0 : index
    %c0_14 = arith.constant 0 : index
    %8 = vector.load %arg17[%c0_13, %c0_14] : memref<128x128xf32, #tpu.memory_space<vmem>>, vector<128x128xf32>
    %cst = arith.constant dense<0.000000e+00> : vector<16x128xf32>
    %9 = tpu.matmul %0, %8, %cst {dimension_numbers = #tpu.dot_dimension_numbers<[1], [0], [0], [1], [0, 0, 1, 1], [], []>} : vector<16x128xf32>, vector<128x128xf32>, vector<16x128xf32> -> vector<16x128xf32>
    %c0_15 = arith.constant 0 : index
    %c0_16 = arith.constant 0 : index
    %10 = vector.load %arg18[%c0_15, %c0_16] : memref<1x128xf32, #tpu.memory_space<vmem>>, vector<1x128xf32>
    %11 = vector.broadcast %10 : vector<1x128xf32> to vector<16x128xf32>
    %12 = arith.addf %9, %11 : vector<16x128xf32>
    %cst_17 = arith.constant 0.000000e+00 : f32
    %13 = vector.broadcast %cst_17 : f32 to vector<16x128xf32>
    %14 = arith.maximumf %12, %13 : vector<16x128xf32>
    %cst_18 = arith.constant dense<0.000000e+00> : vector<16x128xf32>
    %15 = tpu.matmul %7, %14, %cst_18 {dimension_numbers = #tpu.dot_dimension_numbers<[1], [0], [0], [1], [0, 0, 1, 1], [], []>} : vector<16x16xf32>, vector<16x128xf32>, vector<16x128xf32> -> vector<16x128xf32>
    %cst_19 = arith.constant dense<0.000000e+00> : vector<16xf32>
    %16 = vector.multi_reduction <add>, %7, %cst_19 [1] : vector<16x16xf32> to vector<16xf32>
    %17 = vector.shape_cast %16 : vector<16xf32> to vector<16x1xf32>
    %cst_20 = arith.constant 1.000000e-07 : f32
    %18 = vector.broadcast %cst_20 : f32 to vector<16x1xf32>
    %19 = arith.addf %17, %18 : vector<16x1xf32>
    %20 = tpu.reciprocal %19 {approx = true} : vector<16x1xf32> -> vector<16x1xf32>
    %21 = vector.broadcast %20 : vector<16x1xf32> to vector<16x128xf32>
    %22 = arith.mulf %15, %21 : vector<16x128xf32>
    %23 = arith.addf %1, %22 : vector<16x128xf32>
    %c0_21 = arith.constant 0 : index
    %c0_22 = arith.constant 0 : index
    %24 = vector.load %arg22[%c0_21, %c0_22] : memref<16x128xf32, #tpu.memory_space<vmem>>, vector<16x128xf32>
    tpu.vector_store %arg22[%c0_21, %c0_22], %23 {strides = array<i32>} : memref<16x128xf32, #tpu.memory_space<vmem>>, vector<16x128xf32>,
    %c0_23 = arith.constant 0 : index
    %c0_24 = arith.constant 0 : index
    %25 = vector.load %arg15[%c0_23, %c0_24] : memref<128x128xf32, #tpu.memory_space<vmem>>, vector<128x128xf32>
    %cst_25 = arith.constant dense<0.000000e+00> : vector<16x128xf32>
    %26 = tpu.matmul %1, %25, %cst_25 {dimension_numbers = #tpu.dot_dimension_numbers<[1], [0], [0], [1], [0, 0, 1, 1], [], []>} : vector<16x128xf32>, vector<128x128xf32>, vector<16x128xf32> -> vector<16x128xf32>
    %c0_26 = arith.constant 0 : index
    %c0_27 = arith.constant 0 : index
    %27 = vector.load %arg16[%c0_26, %c0_27] : memref<1x128xf32, #tpu.memory_space<vmem>>, vector<1x128xf32>
    %28 = vector.broadcast %27 : vector<1x128xf32> to vector<16x128xf32>
    %29 = arith.addf %26, %28 : vector<16x128xf32>
    %cst_28 = arith.constant 0.000000e+00 : f32
    %30 = vector.broadcast %cst_28 : f32 to vector<16x128xf32>
    %31 = arith.maximumf %29, %30 : vector<16x128xf32>
    %cst_29 = arith.constant dense<0.000000e+00> : vector<16x128xf32>
    %32 = tpu.matmul %4, %31, %cst_29 {dimension_numbers = #tpu.dot_dimension_numbers<[1], [0], [0], [1], [0, 0, 1, 1], [], []>} : vector<16x16xf32>, vector<16x128xf32>, vector<16x128xf32> -> vector<16x128xf32>
    %cst_30 = arith.constant dense<0.000000e+00> : vector<16xf32>
    %33 = vector.multi_reduction <add>, %4, %cst_30 [1] : vector<16x16xf32> to vector<16xf32>
    %34 = vector.shape_cast %33 : vector<16xf32> to vector<16x1xf32>
    %cst_31 = arith.constant 1.000000e-07 : f32
    %35 = vector.broadcast %cst_31 : f32 to vector<16x1xf32>
    %36 = arith.addf %34, %35 : vector<16x1xf32>
    %37 = tpu.reciprocal %36 {approx = true} : vector<16x1xf32> -> vector<16x1xf32>
    %38 = vector.broadcast %37 : vector<16x1xf32> to vector<16x128xf32>
    %39 = arith.mulf %32, %38 : vector<16x128xf32>
    %c0_32 = arith.constant 0 : index
    %c0_33 = arith.constant 0 : index
    %40 = vector.load %arg19[%c0_32, %c0_33] : memref<128x128xf32, #tpu.memory_space<vmem>>, vector<128x128xf32>
    %cst_34 = arith.constant dense<0.000000e+00> : vector<16x128xf32>
    %41 = tpu.matmul %0, %40, %cst_34 {dimension_numbers = #tpu.dot_dimension_numbers<[1], [0], [0], [1], [0, 0, 1, 1], [], []>} : vector<16x128xf32>, vector<128x128xf32>, vector<16x128xf32> -> vector<16x128xf32>
    %c0_35 = arith.constant 0 : index
    %c0_36 = arith.constant 0 : index
    %42 = vector.load %arg20[%c0_35, %c0_36] : memref<1x128xf32, #tpu.memory_space<vmem>>, vector<1x128xf32>
    %43 = vector.broadcast %42 : vector<1x128xf32> to vector<16x128xf32>
    %44 = arith.addf %41, %43 : vector<16x128xf32>
    %cst_37 = arith.constant 0.000000e+00 : f32
    %45 = vector.broadcast %cst_37 : f32 to vector<16x128xf32>
    %46 = arith.maximumf %44, %45 : vector<16x128xf32>
    %cst_38 = arith.constant dense<0.000000e+00> : vector<16x128xf32>
    %47 = tpu.matmul %3, %46, %cst_38 {dimension_numbers = #tpu.dot_dimension_numbers<[1], [0], [0], [1], [0, 0, 1, 1], [], []>} : vector<16x16xf32>, vector<16x128xf32>, vector<16x128xf32> -> vector<16x128xf32>
    %cst_39 = arith.constant dense<0.000000e+00> : vector<16xf32>
    %48 = vector.multi_reduction <add>, %3, %cst_39 [1] : vector<16x16xf32> to vector<16xf32>
    %49 = vector.shape_cast %48 : vector<16xf32> to vector<16x1xf32>
    %cst_40 = arith.constant 1.000000e-07 : f32
    %50 = vector.broadcast %cst_40 : f32 to vector<16x1xf32>
    %51 = arith.addf %49, %50 : vector<16x1xf32>
    %52 = tpu.reciprocal %51 {approx = true} : vector<16x1xf32> -> vector<16x1xf32>
    %53 = vector.broadcast %52 : vector<16x1xf32> to vector<16x128xf32>
    %54 = arith.mulf %47, %53 : vector<16x128xf32>
    %c0_41 = arith.constant 0 : index
    %c0_42 = arith.constant 0 : index
    %55 = vector.load %arg7[%c0_41, %c0_42] : memref<128x128xf32, #tpu.memory_space<vmem>>, vector<128x128xf32>
    %cst_43 = arith.constant dense<0.000000e+00> : vector<24x128xf32>
    %56 = tpu.matmul %2, %55, %cst_43 {dimension_numbers = #tpu.dot_dimension_numbers<[1], [0], [0], [1], [0, 0, 1, 1], [], []>} : vector<24x128xf32>, vector<128x128xf32>, vector<24x128xf32> -> vector<24x128xf32>
    %c0_44 = arith.constant 0 : index
    %c0_45 = arith.constant 0 : index
    %57 = vector.load %arg8[%c0_44, %c0_45] : memref<1x128xf32, #tpu.memory_space<vmem>>, vector<1x128xf32>
    %58 = vector.broadcast %57 : vector<1x128xf32> to vector<24x128xf32>
    %59 = arith.addf %56, %58 : vector<24x128xf32>
    %cst_46 = arith.constant 0.000000e+00 : f32
    %60 = vector.broadcast %cst_46 : f32 to vector<24x128xf32>
    %61 = arith.maximumf %59, %60 : vector<24x128xf32>
    %cst_47 = arith.constant dense<0.000000e+00> : vector<16x128xf32>
    %62 = tpu.matmul %5, %61, %cst_47 {dimension_numbers = #tpu.dot_dimension_numbers<[1], [0], [0], [1], [0, 0, 1, 1], [], []>} : vector<16x24xf32>, vector<24x128xf32>, vector<16x128xf32> -> vector<16x128xf32>
    %cst_48 = arith.constant dense<0.000000e+00> : vector<16xf32>
    %63 = vector.multi_reduction <add>, %5, %cst_48 [1] : vector<16x24xf32> to vector<16xf32>
    %64 = vector.shape_cast %63 : vector<16xf32> to vector<16x1xf32>
    %cst_49 = arith.constant 1.000000e-07 : f32
    %65 = vector.broadcast %cst_49 : f32 to vector<16x1xf32>
    %66 = arith.addf %64, %65 : vector<16x1xf32>
    %67 = tpu.reciprocal %66 {approx = true} : vector<16x1xf32> -> vector<16x1xf32>
    %68 = vector.broadcast %67 : vector<16x1xf32> to vector<16x128xf32>
    %69 = arith.mulf %62, %68 : vector<16x128xf32>
    %c0_50 = arith.constant 0 : index
    %c0_51 = arith.constant 0 : index
    %70 = vector.load %arg9[%c0_50, %c0_51] : memref<128x128xf32, #tpu.memory_space<vmem>>, vector<128x128xf32>
    %cst_52 = arith.constant dense<0.000000e+00> : vector<24x128xf32>
    %71 = tpu.matmul %2, %70, %cst_52 {dimension_numbers = #tpu.dot_dimension_numbers<[1], [0], [0], [1], [0, 0, 1, 1], [], []>} : vector<24x128xf32>, vector<128x128xf32>, vector<24x128xf32> -> vector<24x128xf32>
    %c0_53 = arith.constant 0 : index
    %c0_54 = arith.constant 0 : index
    %72 = vector.load %arg10[%c0_53, %c0_54] : memref<1x128xf32, #tpu.memory_space<vmem>>, vector<1x128xf32>
    %73 = vector.broadcast %72 : vector<1x128xf32> to vector<24x128xf32>
    %74 = arith.addf %71, %73 : vector<24x128xf32>
    %cst_55 = arith.constant 0.000000e+00 : f32
    %75 = vector.broadcast %cst_55 : f32 to vector<24x128xf32>
    %76 = arith.maximumf %74, %75 : vector<24x128xf32>
    %cst_56 = arith.constant dense<0.000000e+00> : vector<16x128xf32>
    %77 = tpu.matmul %6, %76, %cst_56 {dimension_numbers = #tpu.dot_dimension_numbers<[1], [0], [0], [1], [0, 0, 1, 1], [], []>} : vector<16x24xf32>, vector<24x128xf32>, vector<16x128xf32> -> vector<16x128xf32>
    %cst_57 = arith.constant dense<0.000000e+00> : vector<16xf32>
    %78 = vector.multi_reduction <add>, %6, %cst_57 [1] : vector<16x24xf32> to vector<16xf32>
    %79 = vector.shape_cast %78 : vector<16xf32> to vector<16x1xf32>
    %cst_58 = arith.constant 1.000000e-07 : f32
    %80 = vector.broadcast %cst_58 : f32 to vector<16x1xf32>
    %81 = arith.addf %79, %80 : vector<16x1xf32>
    %82 = tpu.reciprocal %81 {approx = true} : vector<16x1xf32> -> vector<16x1xf32>
    %83 = vector.broadcast %82 : vector<16x1xf32> to vector<16x128xf32>
    %84 = arith.mulf %77, %83 : vector<16x128xf32>
    %85 = arith.addf %39, %54 : vector<16x128xf32>
    %86 = arith.addf %85, %69 : vector<16x128xf32>
    %87 = arith.addf %86, %84 : vector<16x128xf32>
    %cst_59 = arith.constant 2.500000e-01 : f32
    %88 = vector.broadcast %cst_59 : f32 to vector<16x128xf32>
    %89 = arith.mulf %88, %87 : vector<16x128xf32>
    %90 = arith.addf %0, %89 : vector<16x128xf32>
    %c0_60 = arith.constant 0 : index
    %c0_61 = arith.constant 0 : index
    %91 = vector.load %arg21[%c0_60, %c0_61] : memref<16x128xf32, #tpu.memory_space<vmem>>, vector<16x128xf32>
    tpu.vector_store %arg21[%c0_60, %c0_61], %90 {strides = array<i32>} : memref<16x128xf32, #tpu.memory_space<vmem>>, vector<16x128xf32>,
    %92 = tpu.transpose %5, [1, 0] : vector<16x24xf32> -> vector<24x16xf32>
    %c0_62 = arith.constant 0 : index
    %c0_63 = arith.constant 0 : index
    %93 = vector.load %arg11[%c0_62, %c0_63] : memref<128x128xf32, #tpu.memory_space<vmem>>, vector<128x128xf32>
    %cst_64 = arith.constant dense<0.000000e+00> : vector<16x128xf32>
    %94 = tpu.matmul %0, %93, %cst_64 {dimension_numbers = #tpu.dot_dimension_numbers<[1], [0], [0], [1], [0, 0, 1, 1], [], []>} : vector<16x128xf32>, vector<128x128xf32>, vector<16x128xf32> -> vector<16x128xf32>
    %c0_65 = arith.constant 0 : index
    %c0_66 = arith.constant 0 : index
    %95 = vector.load %arg12[%c0_65, %c0_66] : memref<1x128xf32, #tpu.memory_space<vmem>>, vector<1x128xf32>
    %96 = vector.broadcast %95 : vector<1x128xf32> to vector<16x128xf32>
    %97 = arith.addf %94, %96 : vector<16x128xf32>
    %cst_67 = arith.constant 0.000000e+00 : f32
    %98 = vector.broadcast %cst_67 : f32 to vector<16x128xf32>
    %99 = arith.maximumf %97, %98 : vector<16x128xf32>
    %cst_68 = arith.constant dense<0.000000e+00> : vector<24x128xf32>
    %100 = tpu.matmul %92, %99, %cst_68 {dimension_numbers = #tpu.dot_dimension_numbers<[1], [0], [0], [1], [0, 0, 1, 1], [], []>} : vector<24x16xf32>, vector<16x128xf32>, vector<24x128xf32> -> vector<24x128xf32>
    %cst_69 = arith.constant dense<0.000000e+00> : vector<24xf32>
    %101 = vector.multi_reduction <add>, %92, %cst_69 [1] : vector<24x16xf32> to vector<24xf32>
    %102 = vector.shape_cast %101 : vector<24xf32> to vector<24x1xf32>
    %cst_70 = arith.constant 1.000000e-07 : f32
    %103 = vector.broadcast %cst_70 : f32 to vector<24x1xf32>
    %104 = arith.addf %102, %103 : vector<24x1xf32>
    %105 = tpu.reciprocal %104 {approx = true} : vector<24x1xf32> -> vector<24x1xf32>
    %106 = vector.broadcast %105 : vector<24x1xf32> to vector<24x128xf32>
    %107 = arith.mulf %100, %106 : vector<24x128xf32>
    %108 = tpu.transpose %6, [1, 0] : vector<16x24xf32> -> vector<24x16xf32>
    %c0_71 = arith.constant 0 : index
    %c0_72 = arith.constant 0 : index
    %109 = vector.load %arg13[%c0_71, %c0_72] : memref<128x128xf32, #tpu.memory_space<vmem>>, vector<128x128xf32>
    %cst_73 = arith.constant dense<0.000000e+00> : vector<16x128xf32>
    %110 = tpu.matmul %0, %109, %cst_73 {dimension_numbers = #tpu.dot_dimension_numbers<[1], [0], [0], [1], [0, 0, 1, 1], [], []>} : vector<16x128xf32>, vector<128x128xf32>, vector<16x128xf32> -> vector<16x128xf32>
    %c0_74 = arith.constant 0 : index
    %c0_75 = arith.constant 0 : index
    %111 = vector.load %arg14[%c0_74, %c0_75] : memref<1x128xf32, #tpu.memory_space<vmem>>, vector<1x128xf32>
    %112 = vector.broadcast %111 : vector<1x128xf32> to vector<16x128xf32>
    %113 = arith.addf %110, %112 : vector<16x128xf32>
    %cst_76 = arith.constant 0.000000e+00 : f32
    %114 = vector.broadcast %cst_76 : f32 to vector<16x128xf32>
    %115 = arith.maximumf %113, %114 : vector<16x128xf32>
    %cst_77 = arith.constant dense<0.000000e+00> : vector<24x128xf32>
    %116 = tpu.matmul %108, %115, %cst_77 {dimension_numbers = #tpu.dot_dimension_numbers<[1], [0], [0], [1], [0, 0, 1, 1], [], []>} : vector<24x16xf32>, vector<16x128xf32>, vector<24x128xf32> -> vector<24x128xf32>
    %cst_78 = arith.constant dense<0.000000e+00> : vector<24xf32>
    %117 = vector.multi_reduction <add>, %108, %cst_78 [1] : vector<24x16xf32> to vector<24xf32>
    %118 = vector.shape_cast %117 : vector<24xf32> to vector<24x1xf32>
    %cst_79 = arith.constant 1.000000e-07 : f32
    %119 = vector.broadcast %cst_79 : f32 to vector<24x1xf32>
    %120 = arith.addf %118, %119 : vector<24x1xf32>
    %121 = tpu.reciprocal %120 {approx = true} : vector<24x1xf32> -> vector<24x1xf32>
    %122 = vector.broadcast %121 : vector<24x1xf32> to vector<24x128xf32>
    %123 = arith.mulf %116, %122 : vector<24x128xf32>
    %124 = arith.addf %107, %123 : vector<24x128xf32>
    %cst_80 = arith.constant 5.000000e-01 : f32
    %125 = vector.broadcast %cst_80 : f32 to vector<24x128xf32>
    %126 = arith.mulf %125, %124 : vector<24x128xf32>
    %127 = arith.addf %2, %126 : vector<24x128xf32>
    %c0_81 = arith.constant 0 : index
    %c0_82 = arith.constant 0 : index
    %128 = vector.load %arg23[%c0_81, %c0_82] : memref<24x128xf32, #tpu.memory_space<vmem>>, vector<24x128xf32>
    tpu.vector_store %arg23[%c0_81, %c0_82], %127 {strides = array<i32>} : memref<24x128xf32, #tpu.memory_space<vmem>>, vector<24x128xf32>,
    return
  }
}

</mosaic_0001>

<bundles_post_ra>
// kernel: graph_conv_layer_forward.1
= control target key start
LH: loop header
LB: loop body
LE: loop exit
PB: predicated region body
PF: predicated region fallthrough
CT: control target
= control target key end

     0   :  { %s1724_s0 = inlined_call_operand.vmem [shape: f32[16,128], index: 0, kind: input, shape index: {}]   ;;  %s1725_s1 = inlined_call_operand.vmem [shape: f32[16,128], index: 1, kind: input, shape index: {}]   ;;  %s1726_s2 = inlined_call_operand.vmem [shape: f32[24,128], index: 2, kind: input, shape index: {}]   ;;  %s1727_s3 = inlined_call_operand.vmem [shape: f32[16,16], index: 3, kind: input, shape index: {}]   ;;  %s1728_s4 = inlined_call_operand.vmem [shape: f32[16,16], index: 4, kind: input, shape index: {}]   ;;  %s1729_s5 = inlined_call_operand.vmem [shape: f32[16,24], index: 5, kind: input, shape index: {}]   ;;  %s1730_s6 = inlined_call_operand.vmem [shape: f32[16,24], index: 6, kind: input, shape index: {}]   ;;  %s1731_s7 = inlined_call_operand.hbm [shape: f32[128,128], index: 7, kind: input, shape index: {}]   ;;  %s1732_s8 = inlined_call_operand.vmem [shape: f32[1,128], index: 8, kind: input, shape index: {}, may-alias: {8,10,12,14,16,18,20}]   ;;  %s1733_s9 = inlined_call_operand.hbm [shape: f32[128,128], index: 9, kind: input, shape index: {}]   ;;  %s1734_s10 = inlined_call_operand.vmem [shape: f32[1,128], index: 10, kind: input, shape index: {}, may-alias: {8,10,12,14,16,18,20}]   ;;  %s1735_s11 = inlined_call_operand.hbm [shape: f32[128,128], index: 11, kind: input, shape index: {}]   ;;  %s1736_s12 = inlined_call_operand.vmem [shape: f32[1,128], index: 12, kind: input, shape index: {}, may-alias: {8,10,12,14,16,18,20}]   ;;  %s1737_s13 = inlined_call_operand.hbm [shape: f32[128,128], index: 13, kind: input, shape index: {}]   ;;  %s1738_s14 = inlined_call_operand.vmem [shape: f32[1,128], index: 14, kind: input, shape index: {}, may-alias: {8,10,12,14,16,18,20}]   ;;  %s1739_s15 = inlined_call_operand.hbm [shape: f32[128,128], index: 15, kind: input, shape index: {}]   ;;  %s1740_s16 = inlined_call_operand.vmem [shape: f32[1,128], index: 16, kind: input, shape index: {}, may-alias: {8,10,12,14,16,18,20}]   ;;  %s1741_s17 = inlined_call_operand.hbm [shape: f32[128,128], index: 17, kind: input, shape index: {}]   ;;  %s1742_s18 = inlined_call_operand.vmem [shape: f32[1,128], index: 18, kind: input, shape index: {}, may-alias: {8,10,12,14,16,18,20}]   ;;  %s1743_s19 = inlined_call_operand.vmem [shape: f32[128,128], index: 19, kind: input, shape index: {}]   ;;  %s1744_s20 = inlined_call_operand.vmem [shape: f32[1,128], index: 20, kind: input, shape index: {}, may-alias: {8,10,12,14,16,18,20}]   ;;  %s1745_s21 = inlined_call_operand.hbm [shape: f32[16,128], index: 21, kind: output, shape index: {0}]   ;;  %s1746_s22 = inlined_call_operand.hbm [shape: f32[16,128], index: 22, kind: output, shape index: {1}]   ;;  %s1747_s23 = inlined_call_operand.hbm [shape: f32[24,128], index: 23, kind: output, shape index: {2}]  }
   0x1   :  { %1755 = sst [smem:[#allocation23_spill]] %s1724_s0 }
   0x2   :  { %1756 = sst [smem:[#allocation24_spill]] %s1725_s1 }
   0x3   :  { %1757 = sst [smem:[#allocation25_spill]] %s1726_s2 }
   0x4   :  { %1758 = sst [smem:[#allocation26_spill]] %s1727_s3 }
   0x5   :  { %1759 = sst [smem:[#allocation27_spill]] %s1728_s4 }
   0x6   :  { %1760 = sst [smem:[#allocation28_spill]] %s1729_s5 }
   0x7   :  { %1761 = sst [smem:[#allocation29_spill]] %s1730_s6 }
   0x8   :  { %1762 = sst [smem:[#allocation30_spill]] %s1731_s7 }
   0x9   :  { %29 = vsyncpa [#allocation3], 0 }
   0xa   :  { %30 = vsyncpa [#allocation6], 0 }
   0xb   :  { %31 = vsyncpa [#allocation9], 0 }
   0xc   :  { %32 = vsyncpa [#allocation12], 0 }
   0xd   :  { %33 = vsyncpa [#allocation4], 0 }
   0xe   :  { %34 = vsyncpa [#allocation15], 0  ;;  %s68_s24 = sshll.u32 %s1733_s9, 4  ;;  %s1296_s25 = smov [#allocation5]   ;;  %s69_s24 = int_to_ptr.hbm [resolvable:$true] %s68_s24 }
   0xf   :  { %s70_s5 = sshll.u32 %s1296_s25, 4  ;;  %s98_s2 = sshll.u32 %s1737_s13, 4  ;;  %s71_s5 = int_to_ptr.vmem [resolvable:$true] %s70_s5  ;;  %s99_s2 = int_to_ptr.hbm [resolvable:$true] %s98_s2 }
  0x10   :  { %s1297_s6 = smov 128   ;;  %s1298_s27 = smov 8  }
  0x11   :  { %76 = dma.hbm_to_vmem [thread:$0]  %s69_s24, 2048, %s71_s5, [#allocation6], %s1297_s6, %s1297_s6, %s1298_s27  }
  0x12   :  { %s1299_s7 = smov [#allocation8]   ;;  %s1763_s9 = sld [smem:[#allocation30_spill]] }
  0x13   :  { %s100_s28 = sshll.u32 %s1299_s7, 4  ;;  %s83_s30 = sshll.u32 %s1735_s11, 4  ;;  %s101_s28 = int_to_ptr.vmem [resolvable:$true] %s100_s28  ;;  %s84_s30 = int_to_ptr.hbm [resolvable:$true] %s83_s30 }
  0x14   :  { %106 = dma.hbm_to_vmem [thread:$0]  %s99_s2, 2048, %s101_s28, [#allocation9], %s1297_s6, %s1297_s6, %s1298_s27  }
  0x15   :  { %s1300_s25 = smov [#allocation2]   ;;  %s1301_s24 = smov [#allocation7]  }
  0x16   :  { %s55_s1 = sshll.u32 %s1300_s25, 4  ;;  %s85_s5 = sshll.u32 %s1301_s24, 4  ;;  %s56_s1 = int_to_ptr.vmem [resolvable:$true] %s55_s1  ;;  %s86_s5 = int_to_ptr.vmem [resolvable:$true] %s85_s5 }
  0x17   :  { %s113_s29 = sshll.u32 %s1739_s15, 4  ;;  %s128_s28 = sshll.u32 %s1741_s17, 4  ;;  %s114_s29 = int_to_ptr.hbm [resolvable:$true] %s113_s29  ;;  %s129_s28 = int_to_ptr.hbm [resolvable:$true] %s128_s28 }
  0x18   :  { %s53_s0 = sshll.u32 %s1763_s9, 4  ;;  %s1302_s3 = smov [#allocation10]   ;;  %s54_s0 = int_to_ptr.hbm [resolvable:$true] %s53_s0 }
  0x19   :  { %61 = dma.hbm_to_vmem [thread:$0]  %s54_s0, 2048, %s56_s1, [#allocation3], %s1297_s6, %s1297_s6, %s1298_s27  }
  0x1a   :  { %91 = dma.hbm_to_vmem [thread:$0]  %s84_s30, 2048, %s86_s5, [#allocation6], %s1297_s6, %s1297_s6, %s1298_s27  }
  0x1b   :  { %s115_s9 = sshll.u32 %s1302_s3, 4  ;;  %s1303_s0 = smov [#allocation11]   ;;  %s116_s9 = int_to_ptr.vmem [resolvable:$true] %s115_s9 }
  0x1c   :  { %121 = dma.hbm_to_vmem [thread:$0]  %s114_s29, 2048, %s116_s9, [#allocation9], %s1297_s6, %s1297_s6, %s1298_s27  }
  0x1d   :  { %s130_s15 = sshll.u32 %s1303_s0, 4  ;;  %s131_s15 = int_to_ptr.vmem [resolvable:$true] %s130_s15 }
  0x1e   :  { %136 = dma.hbm_to_vmem [thread:$0]  %s129_s28, 2048, %s131_s15, [#allocation12], %s1297_s6, %s1297_s6, %s1298_s27  }
  0x1f   :  { %1284 = dma.done.wait [#allocation3], 2048  }
  0x20   :  { %1285 = vsyncadd [#allocation3], 4294965248 }
  0x21   :  { %1286 = dma.done.wait [#allocation6], 4096  }
  0x22   :  { %1287 = vsyncadd [#allocation6], 4294963200 }
  0x23   :  { %1288 = dma.done.wait [#allocation9], 4096  }
  0x24   :  { %1289 = vsyncadd [#allocation9], 4294963200 }
  0x25   :  { %1290 = dma.done.wait [#allocation12], 2048  }
  0x26   :  { %1291 = vsyncadd [#allocation12], 4294965248  ;;  %v229_v0 = vld [vmem:[#allocation11 + $0x78] sm:$0xff]  ;;  %v228_v1 = vld [vmem:[#allocation11 + $0x70] sm:$0xff]  ;;  %s1764_s4 = sld [smem:[#allocation27_spill]]  ;;  %vm259_vm0 = vcmask 130048  }
  0x27   :  { %234 = vmatpush.msra.mxu0 %v229_v0  ;;  %v227_v2 = vld [vmem:[#allocation11 + $0x68] sm:$0xff]  ;;  %v226_v3 = vld [vmem:[#allocation11 + $0x60] sm:$0xff]  ;;  %v225_v5 = vld [vmem:[#allocation11 + $0x58] sm:$0xff]  ;;  %s1765_s1 = sld [smem:[#allocation28_spill]]  ;;  %vm526_vm1 = vcmask 195584   ;;  %s948_s24 = sshll.u32 %s1745_s21, 4  ;;  %s949_s24 = int_to_ptr.hbm [resolvable:$true] %s948_s24 }
  0x28   :  { %v224_v6 = vld [vmem:[#allocation11 + $0x50] sm:$0xff]  ;;  %v320_v8 = vld [vmem:[#allocation10 + $0x78] sm:$0xff]  ;;  %v223_v9 = vld [vmem:[#allocation11 + $0x48] sm:$0xff]  ;;  %s1766_s2 = sld [smem:[#allocation23_spill]]  ;;  %s1305_s5 = smov [#allocation13]  }
  0x29   :  { %235 = vmatpush.msra.mxu0 %v228_v1  ;;  %v319_v11 = vld [vmem:[#allocation10 + $0x70] sm:$0xff]  ;;  %325 = vmatpush.msra.mxu2 %v320_v8  ;;  %v318_v12 = vld [vmem:[#allocation10 + $0x68] sm:$0xff]  ;;  %v222_v13 = vld [vmem:[#allocation11 + $0x40] sm:$0xff]  ;;  %s1767_s15 = sld [smem:[#allocation24_spill]]  ;;  %s1306_s21 = smov [#allocation16]  }
  0x2a   :  { %v221_v14 = vld [vmem:[#allocation11 + $0x38] sm:$0xff]  ;;  %v220_v16 = vld [vmem:[#allocation11 + $0x30] sm:$0xff]  ;;  %v219_v17 = vld [vmem:[#allocation11 + $0x28] sm:$0xff]  ;;  %s1770_s29 = sld [smem:[#allocation25_spill]]  ;;  %s974_s7 = sshll.u32 %s1747_s23, 4  ;;  %s975_s7 = int_to_ptr.hbm [resolvable:$true] %s974_s7 }
  0x2b   :  { %236 = vmatpush.msra.mxu0 %v227_v2  ;;  %326 = vmatpush.msra.mxu2 %v319_v11  ;;  %v218_v18 = vld [vmem:[#allocation11 + $0x20] sm:$0xff]  ;;  %v217_v19 = vld [vmem:[#allocation11 + $0x18] sm:$0xff]  ;;  %v216_v20 = vld [vmem:[#allocation11 + $0x10] sm:$0xff] }
  0x2c   :  { %v1466_v4 = vld [vmem:[%s1764_s4] sm:$0xff]  ;;  %v1477_v10 = vld [vmem:[%s1764_s4 + $0x8] sm:$0xff]  ;;  %v316_v26 = vld [vmem:[#allocation10 + $0x58] sm:$0xff] }
  0x2d   :  { %182 = vxpose.xlu0.b32.start [1/2] (short) (narrow) %v1466_v4, 16  ;;  %237 = vmatpush.msra.mxu0 %v226_v3  ;;  %v1472_v7 = vld [vmem:[%s1765_s1] sm:$0xff]  ;;  %v1484_v15 = vld [vmem:[%s1765_s1 + $0x8] sm:$0xff]  ;;  %v315_v27 = vld [vmem:[#allocation10 + $0x50] sm:$0xff]  ;;  %s1769_s1 = sld [smem:[#allocation26_spill]] }
  0x2e   :  { %670 = vxpose.xlu1.b32.start [1/2] (short) (narrow) %v1472_v7, 24  ;;  %327 = vmatpush.msra.mxu2 %v318_v12  ;;  %v215_v21 = vld [vmem:[#allocation11 + $0x8] sm:$0xff]  ;;  %v214_v22 = vld [vmem:[#allocation11] sm:$0xff]  ;;  %v312_v30 = vld [vmem:[#allocation10 + $0x38] sm:$0xff] }
  0x2f   :  { %238 = vmatpush.msra.mxu0 %v225_v5  ;;  %v1490_v23 = vld [vmem:[%s1766_s2] sm:$0xff]  ;;  %v1496_v24 = vld [vmem:[%s1766_s2 + $0x8] sm:$0xff]  ;;  %v311_v31 = vld [vmem:[#allocation10 + $0x30] sm:$0xff] }
  0x30   :  { %v317_v25 = vld [vmem:[#allocation10 + $0x60] sm:$0xff]  ;;  %v314_v28 = vld [vmem:[#allocation10 + $0x48] sm:$0xff]  ;;  %v308_v34 = vld [vmem:[#allocation10 + $0x18] sm:$0xff] }
  0x31   :  { %239 = vmatpush.msra.mxu0 %v224_v6  ;;  %328 = vmatpush.msra.mxu2 %v317_v25  ;;  %v313_v29 = vld [vmem:[#allocation10 + $0x40] sm:$0xff]  ;;  %v310_v32 = vld [vmem:[#allocation10 + $0x28] sm:$0xff]  ;;  %v307_v35 = vld [vmem:[#allocation10 + $0x10] sm:$0xff] }
  0x32   :  { %v309_v33 = vld [vmem:[#allocation10 + $0x20] sm:$0xff]  ;;  %v306_v36 = vld [vmem:[#allocation10 + $0x8] sm:$0xff]  ;;  %v406_v48 = vld [vmem:[%s1743_s19 + $0x78] sm:$0xff] }
  0x33   :  { %240 = vmatpush.msra.mxu0 %v223_v9  ;;  %329 = vmatpush.msra.mxu2 %v316_v26  ;;  %v305_v37 = vld [vmem:[#allocation10] sm:$0xff]  ;;  %v1508_v40 = vld [vmem:[%s1767_s15 + $0x8] sm:$0xff]  ;;  %v405_v50 = vld [vmem:[%s1743_s19 + $0x70] sm:$0xff] }
  0x34   :  { %v1502_v38 = vld [vmem:[%s1767_s15] sm:$0xff]  ;;  %v404_v51 = vld [vmem:[%s1743_s19 + $0x68] sm:$0xff]  ;;  %v402_v54 = vld [vmem:[%s1743_s19 + $0x58] sm:$0xff]  ;;  %s1768_s15 = sld [smem:[#allocation29_spill]] }
  0x35   :  { %183 = vxpose.xlu0.b32.end [2/2] (short) (narrow) %v1477_v10, 16  ;;  %241 = vmatpush.msra.mxu0 %v222_v13  ;;  %v1029_v41 = vld [vmem:[%s1742_s18] ss:$0 sm:$0xff]  ;;  %v401_v56 = vld [vmem:[%s1743_s19 + $0x50] sm:$0xff]  ;;  %v400_v58 = vld [vmem:[%s1743_s19 + $0x48] sm:$0xff]  ;;  %s946_s18 = sshll.u32 %s1305_s5, 4  ;;  %s947_s18 = int_to_ptr.vmem [resolvable:$true] %s946_s18 }
  0x36   :  { %671 = vxpose.xlu1.b32.end [2/2] (short) (narrow) %v1484_v15, 24  ;;  %330 = vmatpush.msra.mxu2 %v315_v27  ;;  %v403_v52 = vld [vmem:[%s1743_s19 + $0x60] sm:$0xff]  ;;  %v398_v60 = vld [vmem:[%s1743_s19 + $0x38] sm:$0xff]  ;;  %v397_v62 = vld [vmem:[%s1743_s19 + $0x30] sm:$0xff] }
  0x37   :  { %242 = vmatpush.msra.mxu0 %v221_v14  ;;  %v399_v59 = vld [vmem:[%s1743_s19 + $0x40] sm:$0xff]  ;;  %v396_v63 = vld [vmem:[%s1743_s19 + $0x28] sm:$0xff]  ;;  %v394_v1 = vld [vmem:[%s1743_s19 + $0x18] sm:$0xff] }
  0x38   :  { %331 = vmatpush.msra.mxu2 %v314_v28  ;;  %v395_v0 = vld [vmem:[%s1743_s19 + $0x20] sm:$0xff]  ;;  %v393_v2 = vld [vmem:[%s1743_s19 + $0x10] sm:$0xff]  ;;  %v392_v3 = vld [vmem:[%s1743_s19 + $0x8] sm:$0xff] }
  0x39   :  { %243 = vmatpush.msra.mxu0 %v220_v16  ;;  %v391_v5 = vld [vmem:[%s1743_s19] sm:$0xff] }
  0x3a   :  { %332 = vmatpush.msra.mxu2 %v313_v29  ;;  %v1538_v57 = vld [vmem:[%s1768_s15] sm:$0xff]  ;;  %v1554_v61 = vld [vmem:[%s1768_s15 + $0x8] sm:$0xff] }
  0x3b   :  { %244 = vmatpush.msra.mxu0 %v219_v17  ;;  %800 = vxpose.xlu2.b32.start [1/2] (short) (narrow) %v1538_v57, 24  ;;  %v1030_v13 = vld [vmem:[%s1740_s16] ss:$0 sm:$0xff]  ;;  %s961_s16 = sshll.u32 %s1746_s22, 4  ;;  %s972_s22 = sshll.u32 %s1306_s21, 4  ;;  %s962_s16 = int_to_ptr.hbm [resolvable:$true] %s961_s16  ;;  %s973_s22 = int_to_ptr.vmem [resolvable:$true] %s972_s22 }
  0x3c   :  { %333 = vmatpush.msra.mxu2 %v312_v30 }
  0x3d   :  { %245 = vmatpush.msra.mxu0 %v218_v18 }
  0x3e   :  { %334 = vmatpush.msra.mxu2 %v311_v31 }
  0x3f   :  { %246 = vmatpush.msra.mxu0 %v217_v19 }
  0x40   :  { %335 = vmatpush.msra.mxu2 %v310_v32 }
  0x41   :  { %247 = vmatpush.msra.mxu0 %v216_v20 }
  0x42   :  { %336 = vmatpush.msra.mxu2 %v309_v33  ;;  %v583_v33 = vld [vmem:[#allocation5 + $0x78] sm:$0xff] }
  0x43   :  { %248 = vmatpush.msra.mxu0 %v215_v21  ;;  %801 = vxpose.xlu2.b32.end [2/2] (short) (narrow) %v1554_v61, 24 }
  0x44   :  { %337 = vmatpush.msra.mxu2 %v308_v34  ;;  %v582_v34 = vld [vmem:[#allocation5 + $0x70] sm:$0xff] }
  0x45   :  { %249 = vmatpush.msra.mxu0 %v214_v22 }
  0x46   :  { %250 = vmatmul.f32.vlgmr.msra.gmra.mxu0 %v1490_v23  ;;  %338 = vmatpush.msra.mxu2 %v307_v35  ;;  %v581_v35 = vld [vmem:[#allocation5 + $0x68] sm:$0xff] }
  0x48   :  { %339 = vmatpush.msra.mxu2 %v306_v36  ;;  %v379_v36 = vsel %vm259_vm0, %v1466_v4, 0.0 }
  0x4a   :  { %340 = vmatpush.msra.mxu2 %v305_v37  ;;  %v174_v37 = vld [vmem:[%s1769_s1] sm:$0xff] }
  0x4b   :  { %341 = vmatmul.f32.vlgmr.msra.gmra.mxu2 %v1502_v38 }
  0x4c   :  { %588 = vmatpush.msrb.mxu2 %v583_v33 }
  0x4e   :  { %253 = vmatmul.f32.gmra.mxu0 %v1496_v24  ;;  %589 = vmatpush.msrb.mxu2 %v582_v34 }
  0x50   :  { %590 = vmatpush.msrb.mxu2 %v581_v35 }
  0x53   :  { %344 = vmatmul.f32.gmra.mxu2 %v1508_v40 }
  0xbc   :  { %380 = vadd.xlane.f32.xlu2 %v379_v36 }
  0xc3   :  { %v251_v39 = vpop.f32.mrf.mxu0 }
  0xc4   :  { %v252_v43 = vadd.f32 %v1029_v41, %v251_v39  ;;  %v580_v39 = vld [vmem:[#allocation5 + $0x60] sm:$0xff] }
  0xc5   :  { %591 = vmatpush.msrb.mxu2 %v580_v39 }
  0xc6   :  { %v257_v47 = vmax.f32 %v252_v43, 0.0  ;;  %v382_v43 = vsel %vm259_vm0, %v1477_v10, 0.0 }
  0xcb   :  { %v254_v42 = vpop.f32.mrf.mxu0 }
  0xcc   :  { %v255_v44 = vadd.f32 %v1029_v41, %v254_v42  ;;  %v578_v41 = vld [vmem:[#allocation5 + $0x50] sm:$0xff]  ;;  %v577_v42 = vld [vmem:[#allocation5 + $0x48] sm:$0xff] }
  0xce   :  { %v258_v45 = vmax.f32 %v255_v44, 0.0  ;;  %v342_v11 = vpop.f32.mrf.mxu2 }
  0xcf   :  { %v343_v16 = vadd.f32 %v1030_v13, %v342_v11  ;;  %v1621_v11 = vld [vmem:[%s1770_s29 + $0x8] sm:$0xff] }
  0xd0   :  { %280 = vmatpush.msra.mxu1 %v258_v45 }
  0xd1   :  { %v198_v46 = vpop.trf.xlu0  ;;  %v348_v19 = vmax.f32 %v343_v16, 0.0  ;;  %v483_v16 = vld [vmem:[#allocation2 + $0x30] sm:$0xff] }
  0xd2   :  { %v289_v49 = vsel %vm259_vm0, %v198_v46, 0.0  ;;  %281 = vmatpush.msra.mxu1 %v257_v47  ;;  %v1580_v6 = vpop.trf.xlu1  ;;  %v575_v47 = vld [vmem:[#allocation5 + $0x38] sm:$0xff] }
  0xd3   :  { %290 = vadd.xlane.f32.xlu1 %v289_v49  ;;  %999 = vmatmul.msk.f32.vlgmr.msra.gmra.mxu1 %vm259_vm0, %v198_v46  ;;  %v576_v46 = vld [vmem:[#allocation5 + $0x40] sm:$0xff] }
  0xd4   :  { %411 = vmatpush.msrb.mxu1 %v406_v48  ;;  %v574_v48 = vld [vmem:[#allocation5 + $0x30] sm:$0xff]  ;;  %v1031_v49 = vld [vmem:[%s1744_s20] ss:$0 sm:$0xff] }
  0xd6   :  { %412 = vmatpush.msrb.mxu1 %v405_v50  ;;  %v345_v17 = vpop.f32.mrf.mxu2 }
  0xd7   :  { %v346_v18 = vadd.f32 %v1030_v13, %v345_v17  ;;  %v485_v13 = vld [vmem:[#allocation2 + $0x40] sm:$0xff]  ;;  %v1627_v17 = vld [vmem:[%s1770_s29 + $0x10] sm:$0xff] }
  0xd8   :  { %413 = vmatpush.msrb.mxu1 %v404_v51  ;;  %v572_v51 = vld [vmem:[#allocation5 + $0x20] sm:$0xff] }
  0xd9   :  { %v199_v53 = vpop.trf.xlu0  ;;  %v349_v20 = vmax.f32 %v346_v18, 0.0  ;;  %v482_v18 = vld [vmem:[#allocation2 + $0x28] sm:$0xff] }
  0xda   :  { %v292_v55 = vsel %vm259_vm0, %v199_v53, 0.0  ;;  %414 = vmatpush.msrb.mxu1 %v403_v52  ;;  %v1582_v8 = vpop.trf.xlu1 }
  0xdb   :  { %293 = vadd.xlane.f32.xlu0 %v292_v55  ;;  %1000 = vmatmul.msk.f32.gmra.mxu1 %vm259_vm0, %v199_v53 }
  0xdc   :  { %415 = vmatpush.msrb.mxu1 %v402_v54  ;;  %370 = vmatpush.msra.mxu3 %v349_v20  ;;  %v571_v54 = vld [vmem:[#allocation5 + $0x18] sm:$0xff] }
  0xdd   :  { %383 = vadd.xlane.f32.xlu1 %v382_v43  ;;  %v480_v20 = vld [vmem:[#allocation2 + $0x18] sm:$0xff] }
  0xde   :  { %416 = vmatpush.msrb.mxu1 %v401_v56  ;;  %371 = vmatpush.msra.mxu3 %v348_v19  ;;  %v570_v56 = vld [vmem:[#allocation5 + $0x10] sm:$0xff]  ;;  %v481_v19 = vld [vmem:[#allocation2 + $0x20] sm:$0xff] }
  0xdf   :  { %1001 = vmatmul.msk.f32.vlgmr.msra.gmra.mxu3 %vm259_vm0, %v1466_v4  ;;  %v175_v4 = vld [vmem:[%s1769_s1 + $0x8] sm:$0xff] }
  0xe0   :  { %417 = vmatpush.msrb.mxu1 %v400_v58  ;;  %v468_v44 = vsel %vm259_vm0, %v175_v4, 0.0 }
  0xe2   :  { %418 = vmatpush.msrb.mxu1 %v399_v59  ;;  %v1584_v9 = vpop.trf.xlu1  ;;  %v492_v59 = vld [vmem:[#allocation2 + $0x78] sm:$0xff] }
  0xe4   :  { %419 = vmatpush.msrb.mxu1 %v398_v60  ;;  %v569_v60 = vld [vmem:[#allocation5 + $0x8] sm:$0xff] }
  0xe6   :  { %420 = vmatpush.msrb.mxu1 %v397_v62  ;;  %v491_v62 = vld [vmem:[#allocation2 + $0x70] sm:$0xff] }
  0xe7   :  { %1002 = vmatmul.msk.f32.gmra.mxu3 %vm259_vm0, %v1477_v10  ;;  %v573_v10 = vld [vmem:[#allocation5 + $0x28] sm:$0xff] }
  0xe8   :  { %421 = vmatpush.msrb.mxu1 %v396_v63  ;;  %v568_v63 = vld [vmem:[#allocation5] sm:$0xff] }
  0xea   :  { %422 = vmatpush.msrb.mxu1 %v395_v0  ;;  %v1614_v0 = vld [vmem:[%s1770_s29] sm:$0xff] }
  0xec   :  { %423 = vmatpush.msrb.mxu1 %v394_v1  ;;  %v490_v1 = vld [vmem:[#allocation2 + $0x68] sm:$0xff] }
  0xee   :  { %424 = vmatpush.msrb.mxu1 %v393_v2  ;;  %v489_v2 = vld [vmem:[#allocation2 + $0x60] sm:$0xff] }
  0xf0   :  { %425 = vmatpush.msrb.mxu1 %v392_v3  ;;  %v488_v3 = vld [vmem:[#allocation2 + $0x58] sm:$0xff] }
  0xf2   :  { %426 = vmatpush.msrb.mxu1 %v391_v5  ;;  %v487_v5 = vld [vmem:[#allocation2 + $0x50] sm:$0xff] }
  0xf3   :  { %427 = vmatmul.f32.vlgmr.msrb.gmra.mxu1 %v1490_v23 }
  0xfb   :  { %430 = vmatmul.f32.gmra.mxu1 %v1496_v24 }
 0x146   :  { %v291_v12 = vpop.xlane.xlu1 %290 }
 0x147   :  { %v295_v14 = vadd.f32 1e-07, %v291_v12  ;;  %v486_v12 = vld [vmem:[#allocation2 + $0x48] sm:$0xff] }
 0x149   :  { %1036 = vrcp.f32 %v295_v14  ;;  %v484_v14 = vld [vmem:[#allocation2 + $0x38] sm:$0xff] }
 0x14e   :  { %v294_v21 = vpop.xlane.xlu0 %293 }
 0x14f   :  { %v296_v22 = vadd.f32 1e-07, %v294_v21  ;;  %v1037_v25 = vpop.eup %1036  ;;  %v479_v21 = vld [vmem:[#allocation2 + $0x10] sm:$0xff] }
 0x150   :  { %v283_v26 = vpop.f32.mrf.mxu1  ;;  %v384_v35 = vpop.xlane.xlu1 %383 }
 0x151   :  { %1038 = vrcp.f32 %v296_v22  ;;  %v299_v27 = vmul.f32 %v1037_v25, %v283_v26  ;;  %v478_v22 = vld [vmem:[#allocation2 + $0x8] sm:$0xff]  ;;  %v477_v25 = vld [vmem:[#allocation2] sm:$0xff]  ;;  %v1633_v26 = vpop.trf.xlu2 }
 0x153   :  { %v301_v28 = vadd.f32 %v299_v27, %v1502_v38  ;;  %v465_v38 = vsel %vm259_vm0, %v174_v37, 0.0 }
 0x154   :  { %466 = vadd.xlane.f32.xlu0 %v465_v38 }
 0x155   :  { %303 = vst [vmem:[#allocation14] sm:$0xff] %v301_v28 }
 0x157   :  { %v1039_v29 = vpop.eup %1038 }
 0x158   :  { %v286_v30 = vpop.f32.mrf.mxu1 }
 0x159   :  { %v300_v31 = vmul.f32 %v1039_v29, %v286_v30  ;;  %v1635_v27 = vpop.trf.xlu2 }
 0x15b   :  { %v302_v32 = vadd.f32 %v300_v31, %v1508_v40  ;;  %v579_v40 = vld [vmem:[#allocation5 + $0x58] sm:$0xff] }
 0x15c   :  { %592 = vmatpush.msrb.mxu2 %v579_v40  ;;  %469 = vadd.xlane.f32.xlu0 %v468_v44 }
 0x15d   :  { %304 = vst [vmem:[#allocation14 + $0x8] sm:$0xff] %v302_v32 }
 0x15e   :  { %593 = vmatpush.msrb.mxu2 %v578_v41 }
 0x160   :  { %594 = vmatpush.msrb.mxu2 %v577_v42 }
 0x161   :  { %v1637_v28 = vpop.trf.xlu2 }
 0x162   :  { %595 = vmatpush.msrb.mxu2 %v576_v46  ;;  %v373_v29 = vpop.f32.mrf.mxu3 }
 0x164   :  { %596 = vmatpush.msrb.mxu2 %v575_v47 }
 0x166   :  { %597 = vmatpush.msrb.mxu2 %v574_v48 }
 0x168   :  { %598 = vmatpush.msrb.mxu2 %v573_v10 }
 0x169   :  { %v381_v30 = vpop.xlane.xlu2 %380 }
 0x16a   :  { %599 = vmatpush.msrb.mxu2 %v572_v51  ;;  %v385_v32 = vadd.f32 1e-07, %v381_v30  ;;  %v376_v34 = vpop.f32.mrf.mxu3  ;;  %v847_v51 = vld [vmem:[#allocation8 + $0x78] sm:$0xff] }
 0x16c   :  { %600 = vmatpush.msrb.mxu2 %v571_v54  ;;  %1040 = vrcp.f32 %v385_v32  ;;  %v832_v32 = vld [vmem:[#allocation8] sm:$0xff] }
 0x16e   :  { %601 = vmatpush.msrb.mxu2 %v570_v56 }
 0x170   :  { %v428_v45 = vpop.f32.mrf.mxu1  ;;  %602 = vmatpush.msrb.mxu2 %v569_v60  ;;  %v844_v60 = vld [vmem:[#allocation8 + $0x60] sm:$0xff] }
 0x171   :  { %v429_v52 = vadd.f32 %v1031_v49, %v428_v45 }
 0x172   :  { %603 = vmatpush.msrb.mxu2 %v568_v63  ;;  %v1041_v38 = vpop.eup %1040 }
 0x173   :  { %v434_v58 = vmax.f32 %v429_v52, 0.0  ;;  %604 = vmatmul.f32.vlgmr.msrb.gmra.mxu2 %v1614_v0  ;;  %v389_v41 = vmul.f32 %v1041_v38, %v373_v29  ;;  %v846_v52 = vld [vmem:[#allocation8 + $0x70] sm:$0xff] }
 0x174   :  { %v834_v29 = vld [vmem:[#allocation8 + $0x10] sm:$0xff] }
 0x178   :  { %v431_v50 = vpop.f32.mrf.mxu1 }
 0x179   :  { %v432_v53 = vadd.f32 %v1031_v49, %v431_v50 }
 0x17b   :  { %v435_v55 = vmax.f32 %v432_v53, 0.0  ;;  %607 = vmatmul.f32.gmra.mxu2 %v1621_v11  ;;  %v1033_v53 = vld [vmem:[%s1734_s10] ss:$0 sm:$0xff] }
 0x17d   :  { %456 = vmatpush.msrb.mxu3 %v435_v55 }
 0x17f   :  { %457 = vmatpush.msrb.mxu3 %v434_v58  ;;  %v845_v58 = vld [vmem:[#allocation8 + $0x68] sm:$0xff] }
 0x180   :  { %1003 = vmatmul.msk.f32.vlgmr.msrb.gmra.mxu3 %vm259_vm0, %v174_v37  ;;  %v386_v37 = vadd.f32 1e-07, %v384_v35 }
 0x181   :  { %497 = vmatpush.msra.mxu3 %v492_v59 }
 0x183   :  { %498 = vmatpush.msra.mxu3 %v491_v62  ;;  %610 = vmatmul.f32.gmra.mxu2 %v1627_v17  ;;  %v556_v62 = vsel %vm526_vm1, %v1472_v7, 0.0 }
 0x184   :  { %557 = vadd.xlane.f32.xlu2 %v556_v62 }
 0x185   :  { %499 = vmatpush.msra.mxu3 %v490_v1 }
 0x187   :  { %500 = vmatpush.msra.mxu3 %v489_v2  ;;  %v843_v2 = vld [vmem:[#allocation8 + $0x58] sm:$0xff] }
 0x188   :  { %1004 = vmatmul.msk.f32.gmra.mxu3 %vm259_vm0, %v175_v4 }
 0x189   :  { %501 = vmatpush.msra.mxu3 %v488_v3 }
 0x18b   :  { %502 = vmatpush.msra.mxu3 %v487_v5  ;;  %v842_v5 = vld [vmem:[#allocation8 + $0x50] sm:$0xff] }
 0x18d   :  { %503 = vmatpush.msra.mxu3 %v486_v12  ;;  %v841_v12 = vld [vmem:[#allocation8 + $0x48] sm:$0xff] }
 0x18f   :  { %504 = vmatpush.msra.mxu3 %v485_v13  ;;  %v840_v13 = vld [vmem:[#allocation8 + $0x40] sm:$0xff] }
 0x191   :  { %505 = vmatpush.msra.mxu3 %v484_v14  ;;  %v839_v14 = vld [vmem:[#allocation8 + $0x38] sm:$0xff] }
 0x193   :  { %506 = vmatpush.msra.mxu3 %v483_v16  ;;  %v646_v16 = vsel %vm526_vm1, %v1538_v57, 0.0 }
 0x194   :  { %647 = vadd.xlane.f32.xlu2 %v646_v16 }
 0x195   :  { %507 = vmatpush.msra.mxu3 %v482_v18  ;;  %v559_v18 = vsel %vm526_vm1, %v1484_v15, 0.0 }
 0x196   :  { %560 = vadd.xlane.f32.xlu0 %v559_v18 }
 0x197   :  { %508 = vmatpush.msra.mxu3 %v481_v19  ;;  %v838_v19 = vld [vmem:[#allocation8 + $0x30] sm:$0xff] }
 0x199   :  { %509 = vmatpush.msra.mxu3 %v480_v20 }
 0x19b   :  { %510 = vmatpush.msra.mxu3 %v479_v21  ;;  %v837_v21 = vld [vmem:[#allocation8 + $0x28] sm:$0xff] }
 0x19d   :  { %511 = vmatpush.msra.mxu3 %v478_v22  ;;  %v836_v22 = vld [vmem:[#allocation8 + $0x20] sm:$0xff] }
 0x19f   :  { %512 = vmatpush.msra.mxu3 %v477_v25  ;;  %v835_v25 = vld [vmem:[#allocation8 + $0x18] sm:$0xff] }
 0x1a0   :  { %513 = vmatmul.f32.vlgmr.msra.gmra.mxu3 %v1614_v0 }
 0x1a1   :  { %852 = vmatpush.msrb.mxu3 %v847_v51  ;;  %v705_v51 = vld [vmem:[#allocation7 + $0x18] sm:$0xff] }
 0x1a3   :  { %853 = vmatpush.msrb.mxu3 %v846_v52  ;;  %v704_v52 = vld [vmem:[#allocation7 + $0x10] sm:$0xff] }
 0x1a5   :  { %854 = vmatpush.msrb.mxu3 %v845_v58 }
 0x1a7   :  { %855 = vmatpush.msrb.mxu3 %v844_v60 }
 0x1a8   :  { %516 = vmatmul.f32.gmra.mxu3 %v1621_v11 }
 0x1a9   :  { %856 = vmatpush.msrb.mxu3 %v843_v2 }
 0x1ab   :  { %857 = vmatpush.msrb.mxu3 %v842_v5 }
 0x1ad   :  { %858 = vmatpush.msrb.mxu3 %v841_v12 }
 0x1af   :  { %859 = vmatpush.msrb.mxu3 %v840_v13  ;;  %v1034_v13 = vld [vmem:[%s1738_s14] ss:$0 sm:$0xff] }
 0x1b0   :  { %519 = vmatmul.f32.gmra.mxu3 %v1627_v17 }
 0x1b1   :  { %860 = vmatpush.msrb.mxu3 %v839_v14 }
 0x1b3   :  { %861 = vmatpush.msrb.mxu3 %v838_v19 }
 0x1b5   :  { %862 = vmatpush.msrb.mxu3 %v837_v21 }
 0x1b7   :  { %863 = vmatpush.msrb.mxu3 %v836_v22 }
 0x1b9   :  { %864 = vmatpush.msrb.mxu3 %v835_v25 }
 0x1bb   :  { %865 = vmatpush.msrb.mxu3 %v834_v29 }
 0x1c7   :  { %v467_v31 = vpop.xlane.xlu0 %466 }
 0x1c8   :  { %v471_v33 = vadd.f32 1e-07, %v467_v31  ;;  %v833_v31 = vld [vmem:[#allocation8 + $0x8] sm:$0xff] }
 0x1c9   :  { %866 = vmatpush.msrb.mxu3 %v833_v31 }
 0x1ca   :  { %1042 = vrcp.f32 %v471_v33  ;;  %v1032_v33 = vld [vmem:[%s1732_s8] ss:$0 sm:$0xff] }
 0x1cb   :  { %1044 = vrcp.f32 %v386_v37  ;;  %867 = vmatpush.msrb.mxu3 %v832_v32 }
 0x1cc   :  { %868 = vmatmul.f32.vlgmr.msrb.gmra.mxu3 %v1490_v23 }
 0x1cf   :  { %v470_v36 = vpop.xlane.xlu0 %469 }
 0x1d0   :  { %v472_v39 = vadd.f32 1e-07, %v470_v36  ;;  %v1043_v40 = vpop.eup %1042 }
 0x1d1   :  { %v1045_v45 = vpop.eup %1044 }
 0x1d2   :  { %1046 = vrcp.f32 %v472_v39  ;;  %v390_v47 = vmul.f32 %v1045_v45, %v376_v34  ;;  %v712_v45 = vld [vmem:[#allocation7 + $0x50] sm:$0xff] }
 0x1d4   :  { %871 = vmatmul.f32.gmra.mxu3 %v1496_v24 }
 0x1d8   :  { %v1047_v46 = vpop.eup %1046 }
 0x1f6   :  { %v605_v4 = vpop.f32.mrf.mxu2 }
 0x1f7   :  { %v606_v56 = vadd.f32 %v1033_v53, %v605_v4  ;;  %v713_v4 = vld [vmem:[#allocation7 + $0x58] sm:$0xff] }
 0x1f9   :  { %v614_v3 = vmax.f32 %v606_v56, 0.0 }
 0x1fe   :  { %v608_v10 = vpop.f32.mrf.mxu2 }
 0x1ff   :  { %v609_v54 = vadd.f32 %v1033_v53, %v608_v10  ;;  %v706_v10 = vld [vmem:[#allocation7 + $0x20] sm:$0xff] }
 0x201   :  { %v615_v63 = vmax.f32 %v609_v54, 0.0  ;;  %v558_v54 = vpop.xlane.xlu2 %557 }
 0x202   :  { %v562_v58 = vadd.f32 1e-07, %v558_v54 }
 0x203   :  { %v459_v42 = vpop.f32.mrf.mxu3 }
 0x204   :  { %v475_v43 = vmul.f32 %v1043_v40, %v459_v42  ;;  %v717_v40 = vld [vmem:[#allocation7 + $0x78] sm:$0xff]  ;;  %v715_v42 = vld [vmem:[#allocation7 + $0x68] sm:$0xff]  ;;  %1048 = vrcp.f32 %v562_v58 }
 0x206   :  { %v1639_v44 = vadd.f32 %v475_v43, %v389_v41  ;;  %v611_v55 = vpop.f32.mrf.mxu2  ;;  %v716_v41 = vld [vmem:[#allocation7 + $0x70] sm:$0xff]  ;;  %v714_v43 = vld [vmem:[#allocation7 + $0x60] sm:$0xff] }
 0x207   :  { %v612_v59 = vadd.f32 %v1033_v53, %v611_v55  ;;  %v703_v53 = vld [vmem:[#allocation7 + $0x8] sm:$0xff] }
 0x209   :  { %v616_v1 = vmax.f32 %v612_v59, 0.0  ;;  %v561_v55 = vpop.xlane.xlu0 %560  ;;  %v648_v56 = vpop.xlane.xlu2 %647 }
 0x20a   :  { %v652_v59 = vadd.f32 1e-07, %v648_v56  ;;  %v563_v62 = vadd.f32 1e-07, %v561_v55 }
 0x20b   :  { %v462_v48 = vpop.f32.mrf.mxu3  ;;  %636 = vmatpush.msra.mxu1 %v616_v1 }
 0x20c   :  { %v476_v49 = vmul.f32 %v1047_v46, %v462_v48  ;;  %v711_v46 = vld [vmem:[#allocation7 + $0x48] sm:$0xff]  ;;  %v709_v48 = vld [vmem:[#allocation7 + $0x38] sm:$0xff]  ;;  %1050 = vrcp.f32 %v652_v59 }
 0x20d   :  { %637 = vmatpush.msra.mxu1 %v615_v63  ;;  %1052 = vrcp.f32 %v563_v62 }
 0x20e   :  { %v1641_v50 = vadd.f32 %v476_v49, %v390_v47  ;;  %v710_v47 = vld [vmem:[#allocation7 + $0x40] sm:$0xff]  ;;  %v707_v49 = vld [vmem:[#allocation7 + $0x28] sm:$0xff] }
 0x20f   :  { %638 = vmatpush.msra.mxu1 %v614_v3  ;;  %v1049_v3 = vpop.eup %1048 }
 0x210   :  { %1007 = vmatmul.msk.f32.vlgmr.msra.gmra.mxu1 %vm526_vm1, %v1538_v57  ;;  %v649_v57 = vsel %vm526_vm1, %v1554_v61, 0.0 }
 0x211   :  { %650 = vadd.xlane.f32.xlu0 %v649_v57 }
 0x212   :  { %v1051_v5 = vpop.eup %1050 }
 0x213   :  { %v1053_v22 = vpop.eup %1052 }
 0x218   :  { %1008 = vmatmul.msk.f32.gmra.mxu1 %vm526_vm1, %v1554_v61 }
 0x223   :  { %v514_v20 = vpop.f32.mrf.mxu3 }
 0x224   :  { %v515_v61 = vadd.f32 %v1032_v33, %v514_v20 }
 0x226   :  { %v523_v39 = vmax.f32 %v515_v61, 0.0  ;;  %v782_v61 = vsel %vm259_vm0, %v1580_v6, 0.0 }
 0x227   :  { %783 = vadd.xlane.f32.xlu2 %v782_v61 }
 0x22b   :  { %v517_v30 = vpop.f32.mrf.mxu3 }
 0x22c   :  { %v518_v35 = vadd.f32 %v1032_v33, %v517_v30 }
 0x22e   :  { %v524_v38 = vmax.f32 %v518_v35, 0.0 }
 0x233   :  { %v520_v34 = vpop.f32.mrf.mxu3 }
 0x234   :  { %v521_v36 = vadd.f32 %v1032_v33, %v520_v34 }
 0x236   :  { %v525_v37 = vmax.f32 %v521_v36, 0.0 }
 0x238   :  { %546 = vmatpush.msrb.mxu0 %v525_v37  ;;  %v785_v37 = vsel %vm259_vm0, %v1582_v8, 0.0 }
 0x239   :  { %786 = vadd.xlane.f32.xlu0 %v785_v37 }
 0x23a   :  { %547 = vmatpush.msrb.mxu0 %v524_v38 }
 0x23c   :  { %548 = vmatpush.msrb.mxu0 %v523_v39 }
 0x23d   :  { %1005 = vmatmul.msk.f32.vlgmr.msrb.gmra.mxu0 %vm526_vm1, %v1472_v7  ;;  %v708_v7 = vld [vmem:[#allocation7 + $0x30] sm:$0xff] }
 0x23e   :  { %722 = vmatpush.msra.mxu0 %v717_v40  ;;  %v788_v40 = vsel %vm259_vm0, %v1584_v9, 0.0 }
 0x23f   :  { %789 = vadd.xlane.f32.xlu2 %v788_v40 }
 0x240   :  { %723 = vmatpush.msra.mxu0 %v716_v41  ;;  %v912_v41 = vsel %vm259_vm0, %v1633_v26, 0.0 }
 0x241   :  { %913 = vadd.xlane.f32.xlu0 %v912_v41 }
 0x242   :  { %724 = vmatpush.msra.mxu0 %v715_v42 }
 0x244   :  { %725 = vmatpush.msra.mxu0 %v714_v43  ;;  %v1035_v43 = vld [vmem:[%s1736_s12] ss:$0 sm:$0xff]  ;;  %s1304_s12 = smov [#allocation14]  }
 0x245   :  { %1006 = vmatmul.msk.f32.gmra.mxu0 %vm526_vm1, %v1484_v15  ;;  %v702_v15 = vld [vmem:[#allocation7] sm:$0xff]  ;;  %s959_s4 = sshll.u32 %s1304_s12, 4  ;;  %s960_s4 = int_to_ptr.vmem [resolvable:$true] %s959_s4 }
 0x246   :  { %726 = vmatpush.msra.mxu0 %v713_v4  ;;  %967 = dma.vmem_to_hbm [thread:$0]  %s960_s4, 256, %s962_s16, [#allocation15], %s1297_s6, %s1297_s6, %s1298_s27  }
 0x248   :  { %727 = vmatpush.msra.mxu0 %v712_v45 }
 0x24a   :  { %728 = vmatpush.msra.mxu0 %v711_v46 }
 0x24c   :  { %729 = vmatpush.msra.mxu0 %v710_v47 }
 0x24e   :  { %730 = vmatpush.msra.mxu0 %v709_v48 }
 0x24f   :  { %v869_v63 = vpop.f32.mrf.mxu3 }
 0x250   :  { %731 = vmatpush.msra.mxu0 %v708_v7  ;;  %v870_v18 = vadd.f32 %v1034_v13, %v869_v63 }
 0x252   :  { %732 = vmatpush.msra.mxu0 %v707_v49  ;;  %v875_v30 = vmax.f32 %v870_v18, 0.0 }
 0x254   :  { %733 = vmatpush.msra.mxu0 %v706_v10 }
 0x256   :  { %734 = vmatpush.msra.mxu0 %v705_v51 }
 0x257   :  { %v872_v20 = vpop.f32.mrf.mxu3 }
 0x258   :  { %735 = vmatpush.msra.mxu0 %v704_v52  ;;  %v873_v21 = vadd.f32 %v1034_v13, %v872_v20 }
 0x25a   :  { %736 = vmatpush.msra.mxu0 %v703_v53  ;;  %v876_v31 = vmax.f32 %v873_v21, 0.0 }
 0x25c   :  { %737 = vmatpush.msra.mxu0 %v702_v15  ;;  %1015 = vmatpush.msra.mxu2 %v876_v31 }
 0x25d   :  { %738 = vmatmul.f32.vlgmr.msra.gmra.mxu0 %v1490_v23 }
 0x25e   :  { %1016 = vmatpush.msra.mxu2 %v875_v30 }
 0x25f   :  { %1013 = vmatmul.msk.f32.vlgmr.msra.gmra.mxu2 %vm259_vm0, %v1635_v27 }
 0x265   :  { %741 = vmatmul.f32.gmra.mxu0 %v1496_v24 }
 0x267   :  { %1014 = vmatmul.msk.f32.gmra.mxu2 %vm259_vm0, %v1637_v28 }
 0x284   :  { %v651_v60 = vpop.xlane.xlu0 %650 }
 0x285   :  { %v653_v1 = vadd.f32 1e-07, %v651_v60 }
 0x287   :  { %1054 = vrcp.f32 %v653_v1 }
 0x28d   :  { %v640_v2 = vpop.f32.mrf.mxu1  ;;  %v1055_v57 = vpop.eup %1054 }
 0x28e   :  { %v656_v16 = vmul.f32 %v1051_v5, %v640_v2 }
 0x295   :  { %v643_v29 = vpop.f32.mrf.mxu1 }
 0x296   :  { %v657_v36 = vmul.f32 %v1055_v57, %v643_v29 }
 0x2ba   :  { %v550_v12 = vpop.f32.mrf.mxu0 }
 0x2bb   :  { %v566_v14 = vmul.f32 %v1049_v3, %v550_v12 }
 0x2bd   :  { %v660_v19 = vadd.f32 %v1639_v44, %v566_v14 }
 0x2bf   :  { %v662_v25 = vadd.f32 %v660_v19, %v656_v16 }
 0x2c1   :  { %v664_v32 = vmul.f32 0.25, %v662_v25 }
 0x2c2   :  { %v553_v33 = vpop.f32.mrf.mxu0 }
 0x2c3   :  { %v666_v34 = vadd.f32 %v664_v32, %v1490_v23  ;;  %v567_v35 = vmul.f32 %v1053_v22, %v553_v33 }
 0x2c5   :  { %668 = vst [vmem:[#allocation13] sm:$0xff] %v666_v34  ;;  %v661_v44 = vadd.f32 %v1641_v50, %v567_v35  ;;  %v915_v50 = vsel %vm259_vm0, %v1635_v27, 0.0 }
 0x2c6   :  { %916 = vadd.xlane.f32.xlu2 %v915_v50 }
 0x2c7   :  { %v663_v38 = vadd.f32 %v661_v44, %v657_v36 }
 0x2c9   :  { %v665_v39 = vmul.f32 0.25, %v663_v38 }
 0x2cb   :  { %v667_v23 = vadd.f32 %v665_v39, %v1496_v24  ;;  %v918_v24 = vsel %vm259_vm0, %v1637_v28, 0.0 }
 0x2cc   :  { %919 = vadd.xlane.f32.xlu0 %v918_v24 }
 0x2cd   :  { %669 = vst [vmem:[#allocation13 + $0x8] sm:$0xff] %v667_v23 }
 0x2ce   :  { %954 = dma.vmem_to_hbm [thread:$0]  %s947_s18, 256, %s949_s24, [#allocation4], %s1297_s6, %s1297_s6, %s1298_s27  }
 0x2da   :  { %v739_v42 = vpop.f32.mrf.mxu0 }
 0x2db   :  { %v740_v45 = vadd.f32 %v1035_v43, %v739_v42 }
 0x2dd   :  { %v745_v48 = vmax.f32 %v740_v45, 0.0 }
 0x2e2   :  { %v742_v4 = vpop.f32.mrf.mxu0  ;;  %v906_v52 = vpop.f32.mrf.mxu2 }
 0x2e3   :  { %v743_v46 = vadd.f32 %v1035_v43, %v742_v4 }
 0x2e5   :  { %v746_v47 = vmax.f32 %v743_v46, 0.0 }
 0x2e7   :  { %770 = vmatpush.msrb.mxu1 %v746_v47 }
 0x2e9   :  { %771 = vmatpush.msrb.mxu1 %v745_v48 }
 0x2ea   :  { %1009 = vmatmul.msk.f32.vlgmr.msrb.gmra.mxu1 %vm259_vm0, %v1580_v6  ;;  %v784_v6 = vpop.xlane.xlu2 %783  ;;  %v909_v63 = vpop.f32.mrf.mxu2 }
 0x2eb   :  { %900 = vmatpush.msra.mxu1 %v876_v31  ;;  %v791_v62 = vadd.f32 1e-07, %v784_v6 }
 0x2ed   :  { %901 = vmatpush.msra.mxu1 %v875_v30 }
 0x2f2   :  { %1010 = vmatmul.msk.f32.gmra.mxu1 %vm259_vm0, %v1582_v8  ;;  %v787_v8 = vpop.xlane.xlu0 %786 }
 0x2f3   :  { %v792_v7 = vadd.f32 1e-07, %v787_v8 }
 0x2fa   :  { %1011 = vmatmul.msk.f32.gmra.mxu1 %vm259_vm0, %v1584_v9  ;;  %v790_v9 = vpop.xlane.xlu2 %789 }
 0x2fb   :  { %v793_v15 = vadd.f32 1e-07, %v790_v9 }
 0x302   :  { %1012 = vmatmul.msk.f32.vlgmr.msra.gmra.mxu1 %vm259_vm0, %v1633_v26  ;;  %v914_v26 = vpop.xlane.xlu0 %913 }
 0x303   :  { %v921_v3 = vadd.f32 1e-07, %v914_v26 }
 0x339   :  { %v917_v27 = vpop.xlane.xlu2 %916 }
 0x33a   :  { %v922_v28 = vadd.f32 1e-07, %v917_v27 }
 0x33c   :  { %1056 = vrcp.f32 %v922_v28 }
 0x33d   :  { %1058 = vrcp.f32 %v792_v7 }
 0x33f   :  { %v920_v49 = vpop.xlane.xlu0 %919 }
 0x340   :  { %v923_v51 = vadd.f32 1e-07, %v920_v49 }
 0x342   :  { %v1057_v53 = vpop.eup %1056  ;;  %1060 = vrcp.f32 %v923_v51 }
 0x343   :  { %v1059_v54 = vpop.eup %1058  ;;  %v928_v55 = vmul.f32 %v1057_v53, %v906_v52  ;;  %1062 = vrcp.f32 %v793_v15 }
 0x344   :  { %1064 = vrcp.f32 %v791_v62 }
 0x345   :  { %1066 = vrcp.f32 %v921_v3 }
 0x348   :  { %v1061_v60 = vpop.eup %1060 }
 0x349   :  { %v1063_v2 = vpop.eup %1062  ;;  %v929_v12 = vmul.f32 %v1061_v60, %v909_v63 }
 0x34a   :  { %v1065_v19 = vpop.eup %1064 }
 0x34b   :  { %v1067_v21 = vpop.eup %1066 }
 0x367   :  { %v773_v10 = vpop.f32.mrf.mxu1 }
 0x368   :  { %v797_v25 = vmul.f32 %v1065_v19, %v773_v10 }
 0x36f   :  { %v776_v56 = vpop.f32.mrf.mxu1 }
 0x370   :  { %v798_v58 = vmul.f32 %v1059_v54, %v776_v56 }
 0x372   :  { %v931_v59 = vadd.f32 %v928_v55, %v798_v58 }
 0x374   :  { %v934_v1 = vmul.f32 0.5, %v931_v59 }
 0x376   :  { %v937_v5 = vadd.f32 %v934_v1, %v1621_v11 }
 0x377   :  { %v779_v13 = vpop.f32.mrf.mxu1 }
 0x378   :  { %v799_v14 = vmul.f32 %v1063_v2, %v779_v13  ;;  %940 = vst [vmem:[#allocation16 + $0x8] sm:$0xff] %v937_v5 }
 0x37a   :  { %v932_v16 = vadd.f32 %v929_v12, %v799_v14 }
 0x37c   :  { %v935_v18 = vmul.f32 0.5, %v932_v16 }
 0x37e   :  { %v938_v20 = vadd.f32 %v935_v18, %v1627_v17 }
 0x37f   :  { %v903_v22 = vpop.f32.mrf.mxu1 }
 0x380   :  { %v927_v57 = vmul.f32 %v1067_v21, %v903_v22  ;;  %941 = vst [vmem:[#allocation16 + $0x10] sm:$0xff] %v938_v20 }
 0x382   :  { %v930_v29 = vadd.f32 %v927_v57, %v797_v25 }
 0x384   :  { %v933_v11 = vmul.f32 0.5, %v930_v29 }
 0x386   :  { %v936_v30 = vadd.f32 %v933_v11, %v1614_v0 }
 0x388   :  { %939 = vst [vmem:[#allocation16] sm:$0xff] %v936_v30 }
 0x389   :  { %980 = dma.vmem_to_hbm [thread:$0]  %s973_s22, 384, %s975_s7, [#allocation15], %s1297_s6, %s1297_s6, %s1298_s27  }
 0x38a   :  { %1292 = dma.done.wait [#allocation4], 256  }
 0x38b   :  { %1293 = vsyncadd [#allocation4], 4294967040 }
 0x38c   :  { %1294 = dma.done.wait [#allocation15], 640  }
 0x38d   :  { %1295 = vsyncadd [#allocation15], 4294966656 }
 0x38e   :  { %993 = vsyncpa [#allocation3], 1 }
 0x38f   :  { %994 = vsyncpa [#allocation6], 1 }
 0x390   :  { %995 = vsyncpa [#allocation9], 1 }
 0x391   :  { %996 = vsyncpa [#allocation12], 1 }
 0x392   :  { %997 = vsyncpa [#allocation4], 1 }
 0x393   :  { %998 = vsyncpa [#allocation15], 1 }

</bundles_post_ra>
